<compile_context>
chip_gen: v5e
topology: v5e:2x2
jax: 0.10.0
libtpu: 0.0.40
codegen_flags: <defaults>
</compile_context>

<pallas_src>
import functools

import jax
import jax.numpy as jnp
from jax import lax
from jax.experimental import pallas as pl
from jax.experimental.pallas import tpu as pltpu


# ---------------------------------------------------------------------------
# Fused kernel: bb batch elements per grid step, all intermediates in VMEM/vregs
# ---------------------------------------------------------------------------
def fused_patch_embed_kernel(x_ref, wt_ref, b_ref, cls_ref, pos0_ref, posb_ref,
                             cls_o_ref, body_o_ref, *, bb, c, h, emb):
    """
    x_ref    : (bb, h*c, w)   input rows ordered (hi, ci)  (wrapper transpose+reshape)
    wt_ref   : (w, emb)       Linear weight, pre-transposed; shared by both linears
    b_ref    : (1, emb)       Linear bias
    cls_ref  : (1, emb)       cls token (flattened)
    pos0_ref : (1, emb)       positional embedding row 0 (cls row)
    posb_ref : (h*emb, emb)   positional embedding rows 1..N (body rows)
    cls_o_ref  : (bb, 1, emb)
    body_o_ref : (bb, h*emb, emb)
    """
    wt = wt_ref[...]                      # (w, E) -- loaded once, reused by both linears
    bias = b_ref[...]                     # (1, E)

    # --- cls row (batch independent): cls + pos[0] ------------------------------
    cls_row = cls_ref[...] + pos0_ref[...]            # (1, E)
    for bi in range(bb):                              # bb is tiny; static unroll
        cls_o_ref[bi] = cls_row.astype(cls_o_ref.dtype)

    # --- first Linear (over w), batched over (bb, h, c) as one MXU call ---------
    # rows ordered (bi, hi, ci); leading-dim collapse is layout-free.
    a = x_ref[...].reshape(bb * h * c, x_ref.shape[-1])
    x1 = jnp.dot(a, wt, preferred_element_type=jnp.float32) + bias     # (bb*h*c, E)

    # Fold the second Linear's bias into the positional embedding once (hoisted).
    pos_bias = posb_ref[...] + bias                                    # (N, E)

    # --- rearrange 'c e -> e c' + second Linear (over c), per (bi, hi) block ----
    # dot_general contracting dim 0 of both operands == transposed-LHS matmul on
    # the MXU; no explicit (c, E) transpose.  All slice offsets are static and
    # multiples of 8 sublanes (c = E = 16).
    for bi in range(bb):
        for hi in range(h):
            row0 = (bi * h + hi) * c
            blk = x1[row0:row0 + c, :]                                 # (c, E)
            out_blk = lax.dot_general(
                blk, wt, (((0,), (0,)), ((), ())),
                preferred_element_type=jnp.float32)                    # (E, E)
            r0 = hi * emb                                              # 8-aligned
            body_o_ref[bi, r0:r0 + emb, :] = (
                out_blk + pos_bias[r0:r0 + emb, :]).astype(body_o_ref.dtype)


def _pick_batch_block(b, cap=8):
    """Largest divisor of b that is <= cap, while keeping >= 2 grid steps
    (so v7x's two TensorCores both get 'parallel' work)."""
    if b <= 1:
        return 1
    target = max(1, min(cap, b // 2))
    for bb in range(target, 0, -1):
        if b % bb == 0:
            return bb
    return 1


# ---------------------------------------------------------------------------
# Forward pass (wrapper: free/tiny layout plumbing + one pallas_call)
# ---------------------------------------------------------------------------
def patch_embedding_forward(x, params, *, batch_block=8):
    """x: (b, c, h, w) float32 NCHW. Requires w == c == out_channels."""
    w_lin = params["proj_w"]       # (emb_size, out_channels) -- PyTorch Linear layout
    b_lin = params["proj_b"]       # (emb_size,)
    cls = params["cls_token"]      # (1, 1, emb_size)
    pos = params["pos_emb"]        # (num_patches + 1, emb_size)

    b, c, h, w = x.shape
    E, K = w_lin.shape
    assert w == K and c == K, (w, c, K)       # module's implicit shape constraint
    N = h * E
    assert pos.shape == (N + 1, E), (pos.shape, N, E)

    wt = jnp.transpose(w_lin)                 # (K, E) for the MXU
    b2 = b_lin.reshape(1, E)
    cls2 = cls.reshape(1, E)
    pos0 = pos[:1]                            # cls-row positional embedding
    posb = pos[1:]                            # body positional embedding (8-aligned rows)
    # (b,c,h,w) -> (b,h,c,w) -> (b, h*c, w): rows ordered (hi, ci) so the kernel
    # reads contiguous aligned slices (no sublane-strided gather).
    x2d = jnp.transpose(x, (0, 2, 1, 3)).reshape(b, h * c, w)

    bb = _pick_batch_block(b, batch_block)
    grid = (b // bb,)

    kernel = functools.partial(fused_patch_embed_kernel, bb=bb, c=c, h=h, emb=E)
    cls_out, body_out = pl.pallas_call(
        kernel,
        out_shape=(
            jax.ShapeDtypeStruct((b, 1, E), jnp.float32),
            jax.ShapeDtypeStruct((b, N, E), jnp.float32),
        ),
        grid=grid,
        in_specs=[
            pl.BlockSpec((bb, h * c, w), lambda i: (i, 0, 0)),   # x   (per-step batch block)
            pl.BlockSpec((K, E), lambda i: (0, 0)),              # weight (shared)
            pl.BlockSpec((1, E), lambda i: (0, 0)),              # bias   (shared)
            pl.BlockSpec((1, E), lambda i: (0, 0)),              # cls    (shared)
            pl.BlockSpec((1, E), lambda i: (0, 0)),              # pos[0] (shared)
            pl.BlockSpec((N, E), lambda i: (0, 0)),              # pos[1:] (shared)
        ],
        out_specs=(
            pl.BlockSpec((bb, 1, E), lambda i: (i, 0, 0)),       # cls rows
            pl.BlockSpec((bb, N, E), lambda i: (i, 0, 0)),       # body rows
        ),
        compiler_params=pltpu.CompilerParams(dimension_semantics=("parallel",)),
    )(x2d, wt, b2, cls2, pos0, posb)

    # Reassemble the module's (b, N+1, E) output; tiny XLA concat outside the kernel.
    return jnp.concatenate([cls_out, body_out], axis=1)


def patch_embedding_ref(x, params):
    """Pure-JAX reference mirroring the PyTorch forward exactly."""
    w_lin, b_lin = params["proj_w"], params["proj_b"]
    cls, pos = params["cls_token"], params["pos_emb"]
    b, c, h, w = x.shape
    E = w_lin.shape[0]
    x1 = x @ w_lin.T + b_lin                               # (b, c, h, E)
    x2 = jnp.transpose(x1, (0, 2, 3, 1)).reshape(b, h * E, c)
    x3 = x2 @ w_lin.T + b_lin                              # (b, h*E, E)
    cls_b = jnp.broadcast_to(cls, (b, 1, E))
    return jnp.concatenate([cls_b, x3], axis=1) + pos


if __name__ == "__main__":
    # Module config chosen so the forward (as written) is shape-consistent.
    out_channels = 16
    emb_size = 16
    patch_size = 8
    img_size = 64
    num_patches = (img_size // patch_size) ** 2      # 64

    batch = 2
    c = out_channels                                  # second Linear eats the channel axis
    w = out_channels                                  # first Linear eats the width axis
    h = num_patches // emb_size                       # h * emb_size == num_patches

    key = jax.random.PRNGKey(0)
    k_x, k_w, k_b, k_cls, k_pos = jax.random.split(key, 5)
    x = jax.random.normal(k_x, (batch, c, h, w), dtype=jnp.float32)
    params = {
        "proj_w": 0.1 * jax.random.normal(k_w, (emb_size, out_channels), jnp.float32),
        "proj_b": 0.1 * jax.random.normal(k_b, (emb_size,), jnp.float32),
        "cls_token": jax.random.normal(k_cls, (1, 1, emb_size), jnp.float32),
        "pos_emb": jax.random.normal(k_pos, (num_patches + 1, emb_size), jnp.float32),
    }

    out = jax.jit(patch_embedding_forward)(x, params)
    out = jax.block_until_ready(out)

    ref = patch_embedding_ref(x, params)
    assert out.shape == (batch, num_patches + 1, emb_size), out.shape
    assert jnp.allclose(out, ref, atol=1e-4, rtol=1e-4), float(jnp.max(jnp.abs(out - ref)))
    print("KERNEL_OK")
</pallas_src>

<mosaic_0001>
module attributes {stable_mosaic.version = 11 : i64} {
  func.func @fused_patch_embed_kernel(%arg0: i32, %arg1: memref<1x64x16xf32, #tpu.memory_space<vmem>>, %arg2: memref<16x16xf32, #tpu.memory_space<vmem>>, %arg3: memref<1x16xf32, #tpu.memory_space<vmem>>, %arg4: memref<1x16xf32, #tpu.memory_space<vmem>>, %arg5: memref<1x16xf32, #tpu.memory_space<vmem>>, %arg6: memref<64x16xf32, #tpu.memory_space<vmem>>, %arg7: memref<1x1x16xf32, #tpu.memory_space<vmem>>, %arg8: memref<1x64x16xf32, #tpu.memory_space<vmem>>) attributes {dimension_semantics = [#tpu.dimension_semantics<parallel>], iteration_bounds = array<i64: 2>, scalar_prefetch = 0 : i64, scratch_operands = 0 : i64, tpu.core_type = #tpu.core_type<tc>, window_params = [{transform_indices = @transform_0, window_bounds = array<i64: 1, 64, 16>}, {pipeline_mode = #tpu.pipeline_mode<synchronous>, transform_indices = @transform_1, window_bounds = array<i64: 16, 16>}, {pipeline_mode = #tpu.pipeline_mode<synchronous>, transform_indices = @transform_2, window_bounds = array<i64: 1, 16>}, {pipeline_mode = #tpu.pipeline_mode<synchronous>, transform_indices = @transform_3, window_bounds = array<i64: 1, 16>}, {pipeline_mode = #tpu.pipeline_mode<synchronous>, transform_indices = @transform_4, window_bounds = array<i64: 1, 16>}, {pipeline_mode = #tpu.pipeline_mode<synchronous>, transform_indices = @transform_5, window_bounds = array<i64: 64, 16>}, {transform_indices = @transform_6, window_bounds = array<i64: 1, 1, 16>}, {transform_indices = @transform_7, window_bounds = array<i64: 1, 64, 16>}]} {
    %c0 = arith.constant 0 : index
    %c0_0 = arith.constant 0 : index
    %0 = vector.load %arg2[%c0, %c0_0] : memref<16x16xf32, #tpu.memory_space<vmem>>, vector<16x16xf32>
    %c0_1 = arith.constant 0 : index
    %c0_2 = arith.constant 0 : index
    %1 = vector.load %arg3[%c0_1, %c0_2] : memref<1x16xf32, #tpu.memory_space<vmem>>, vector<1x16xf32>
    %c0_3 = arith.constant 0 : index
    %c0_4 = arith.constant 0 : index
    %2 = vector.load %arg4[%c0_3, %c0_4] : memref<1x16xf32, #tpu.memory_space<vmem>>, vector<1x16xf32>
    %c0_5 = arith.constant 0 : index
    %c0_6 = arith.constant 0 : index
    %3 = vector.load %arg5[%c0_5, %c0_6] : memref<1x16xf32, #tpu.memory_space<vmem>>, vector<1x16xf32>
    %4 = arith.addf %2, %3 : vector<1x16xf32>
    %c0_7 = arith.constant 0 : index
    %c0_8 = arith.constant 0 : index
    %c0_9 = arith.constant 0 : index
    %5 = vector.load %arg7[%c0_7, %c0_8, %c0_9] : memref<1x1x16xf32, #tpu.memory_space<vmem>>, vector<1x1x16xf32>
    %6 = vector.shape_cast %5 : vector<1x1x16xf32> to vector<1x16xf32>
    %7 = vector.shape_cast %4 : vector<1x16xf32> to vector<1x1x16xf32>
    tpu.vector_store %arg7[%c0_7, %c0_8, %c0_9], %7 {strides = array<i32>} : memref<1x1x16xf32, #tpu.memory_space<vmem>>, vector<1x1x16xf32>,
    %c0_10 = arith.constant 0 : index
    %c0_11 = arith.constant 0 : index
    %c0_12 = arith.constant 0 : index
    %8 = vector.load %arg1[%c0_10, %c0_11, %c0_12] : memref<1x64x16xf32, #tpu.memory_space<vmem>>, vector<1x64x16xf32>
    %9 = vector.shape_cast %8 : vector<1x64x16xf32> to vector<64x16xf32>
    %cst = arith.constant dense<0.000000e+00> : vector<64x16xf32>
    %10 = tpu.matmul %9, %0, %cst {dimension_numbers = #tpu.dot_dimension_numbers<[1], [0], [0], [1], [0, 0, 1, 1], [], []>} : vector<64x16xf32>, vector<16x16xf32>, vector<64x16xf32> -> vector<64x16xf32>
    %11 = vector.broadcast %1 : vector<1x16xf32> to vector<64x16xf32>
    %12 = arith.addf %10, %11 : vector<64x16xf32>
    %c0_13 = arith.constant 0 : index
    %c0_14 = arith.constant 0 : index
    %13 = vector.load %arg6[%c0_13, %c0_14] : memref<64x16xf32, #tpu.memory_space<vmem>>, vector<64x16xf32>
    %14 = vector.broadcast %1 : vector<1x16xf32> to vector<64x16xf32>
    %15 = arith.addf %13, %14 : vector<64x16xf32>
    %16 = vector.extract_strided_slice %12 {offsets = [0, 0], sizes = [16, 16], strides = [1, 1]} : vector<64x16xf32> to vector<16x16xf32>
    %cst_15 = arith.constant dense<0.000000e+00> : vector<16x16xf32>
    %17 = tpu.matmul %16, %0, %cst_15 {dimension_numbers = #tpu.dot_dimension_numbers<[0], [0], [1], [1], [0, 1, 1, 1], [], []>} : vector<16x16xf32>, vector<16x16xf32>, vector<16x16xf32> -> vector<16x16xf32>
    %18 = vector.extract_strided_slice %15 {offsets = [0, 0], sizes = [16, 16], strides = [1, 1]} : vector<64x16xf32> to vector<16x16xf32>
    %19 = arith.addf %17, %18 : vector<16x16xf32>
    %c0_16 = arith.constant 0 : index
    %c0_17 = arith.constant 0 : index
    %c0_18 = arith.constant 0 : index
    %20 = vector.load %arg8[%c0_16, %c0_17, %c0_18] : memref<1x64x16xf32, #tpu.memory_space<vmem>>, vector<1x16x16xf32>
    %21 = vector.shape_cast %20 : vector<1x16x16xf32> to vector<16x16xf32>
    %22 = vector.shape_cast %19 : vector<16x16xf32> to vector<1x16x16xf32>
    tpu.vector_store %arg8[%c0_16, %c0_17, %c0_18], %22 {strides = array<i32>} : memref<1x64x16xf32, #tpu.memory_space<vmem>>, vector<1x16x16xf32>,
    %23 = vector.extract_strided_slice %12 {offsets = [16, 0], sizes = [16, 16], strides = [1, 1]} : vector<64x16xf32> to vector<16x16xf32>
    %cst_19 = arith.constant dense<0.000000e+00> : vector<16x16xf32>
    %24 = tpu.matmul %23, %0, %cst_19 {dimension_numbers = #tpu.dot_dimension_numbers<[0], [0], [1], [1], [0, 1, 1, 1], [], []>} : vector<16x16xf32>, vector<16x16xf32>, vector<16x16xf32> -> vector<16x16xf32>
    %25 = vector.extract_strided_slice %15 {offsets = [16, 0], sizes = [16, 16], strides = [1, 1]} : vector<64x16xf32> to vector<16x16xf32>
    %26 = arith.addf %24, %25 : vector<16x16xf32>
    %c0_20 = arith.constant 0 : index
    %c16 = arith.constant 16 : index
    %c0_21 = arith.constant 0 : index
    %27 = vector.load %arg8[%c0_20, %c16, %c0_21] : memref<1x64x16xf32, #tpu.memory_space<vmem>>, vector<1x16x16xf32>
    %28 = vector.shape_cast %27 : vector<1x16x16xf32> to vector<16x16xf32>
    %29 = vector.shape_cast %26 : vector<16x16xf32> to vector<1x16x16xf32>
    tpu.vector_store %arg8[%c0_20, %c16, %c0_21], %29 {strides = array<i32>} : memref<1x64x16xf32, #tpu.memory_space<vmem>>, vector<1x16x16xf32>,
    %30 = vector.extract_strided_slice %12 {offsets = [32, 0], sizes = [16, 16], strides = [1, 1]} : vector<64x16xf32> to vector<16x16xf32>
    %cst_22 = arith.constant dense<0.000000e+00> : vector<16x16xf32>
    %31 = tpu.matmul %30, %0, %cst_22 {dimension_numbers = #tpu.dot_dimension_numbers<[0], [0], [1], [1], [0, 1, 1, 1], [], []>} : vector<16x16xf32>, vector<16x16xf32>, vector<16x16xf32> -> vector<16x16xf32>
    %32 = vector.extract_strided_slice %15 {offsets = [32, 0], sizes = [16, 16], strides = [1, 1]} : vector<64x16xf32> to vector<16x16xf32>
    %33 = arith.addf %31, %32 : vector<16x16xf32>
    %c0_23 = arith.constant 0 : index
    %c32 = arith.constant 32 : index
    %c0_24 = arith.constant 0 : index
    %34 = vector.load %arg8[%c0_23, %c32, %c0_24] : memref<1x64x16xf32, #tpu.memory_space<vmem>>, vector<1x16x16xf32>
    %35 = vector.shape_cast %34 : vector<1x16x16xf32> to vector<16x16xf32>
    %36 = vector.shape_cast %33 : vector<16x16xf32> to vector<1x16x16xf32>
    tpu.vector_store %arg8[%c0_23, %c32, %c0_24], %36 {strides = array<i32>} : memref<1x64x16xf32, #tpu.memory_space<vmem>>, vector<1x16x16xf32>,
    %37 = vector.extract_strided_slice %12 {offsets = [48, 0], sizes = [16, 16], strides = [1, 1]} : vector<64x16xf32> to vector<16x16xf32>
    %cst_25 = arith.constant dense<0.000000e+00> : vector<16x16xf32>
    %38 = tpu.matmul %37, %0, %cst_25 {dimension_numbers = #tpu.dot_dimension_numbers<[0], [0], [1], [1], [0, 1, 1, 1], [], []>} : vector<16x16xf32>, vector<16x16xf32>, vector<16x16xf32> -> vector<16x16xf32>
    %39 = vector.extract_strided_slice %15 {offsets = [48, 0], sizes = [16, 16], strides = [1, 1]} : vector<64x16xf32> to vector<16x16xf32>
    %40 = arith.addf %38, %39 : vector<16x16xf32>
    %c0_26 = arith.constant 0 : index
    %c48 = arith.constant 48 : index
    %c0_27 = arith.constant 0 : index
    %41 = vector.load %arg8[%c0_26, %c48, %c0_27] : memref<1x64x16xf32, #tpu.memory_space<vmem>>, vector<1x16x16xf32>
    %42 = vector.shape_cast %41 : vector<1x16x16xf32> to vector<16x16xf32>
    %43 = vector.shape_cast %40 : vector<16x16xf32> to vector<1x16x16xf32>
    tpu.vector_store %arg8[%c0_26, %c48, %c0_27], %43 {strides = array<i32>} : memref<1x64x16xf32, #tpu.memory_space<vmem>>, vector<1x16x16xf32>,
    return
  }
  func.func @transform_0(%arg0: i32) -> (i32, i32, i32) {
    %c0_i32 = arith.constant 0 : i32
    %c0_i32_0 = arith.constant 0 : i32
    %c0_i32_1 = arith.constant 0 : i32
    return %arg0, %c0_i32, %c0_i32_0 : i32, i32, i32
  }
  func.func @transform_1(%arg0: i32) -> (i32, i32) {
    %c0_i32 = arith.constant 0 : i32
    %c0_i32_0 = arith.constant 0 : i32
    %c0_i32_1 = arith.constant 0 : i32
    return %c0_i32, %c0_i32_0 : i32, i32
  }
  func.func @transform_2(%arg0: i32) -> (i32, i32) {
    %c0_i32 = arith.constant 0 : i32
    %c0_i32_0 = arith.constant 0 : i32
    %c0_i32_1 = arith.constant 0 : i32
    return %c0_i32, %c0_i32_0 : i32, i32
  }
  func.func @transform_3(%arg0: i32) -> (i32, i32) {
    %c0_i32 = arith.constant 0 : i32
    %c0_i32_0 = arith.constant 0 : i32
    %c0_i32_1 = arith.constant 0 : i32
    return %c0_i32, %c0_i32_0 : i32, i32
  }
  func.func @transform_4(%arg0: i32) -> (i32, i32) {
    %c0_i32 = arith.constant 0 : i32
    %c0_i32_0 = arith.constant 0 : i32
    %c0_i32_1 = arith.constant 0 : i32
    return %c0_i32, %c0_i32_0 : i32, i32
  }
  func.func @transform_5(%arg0: i32) -> (i32, i32) {
    %c0_i32 = arith.constant 0 : i32
    %c0_i32_0 = arith.constant 0 : i32
    %c0_i32_1 = arith.constant 0 : i32
    return %c0_i32, %c0_i32_0 : i32, i32
  }
  func.func @transform_6(%arg0: i32) -> (i32, i32, i32) {
    %c0_i32 = arith.constant 0 : i32
    %c0_i32_0 = arith.constant 0 : i32
    %c0_i32_1 = arith.constant 0 : i32
    return %arg0, %c0_i32, %c0_i32_0 : i32, i32, i32
  }
  func.func @transform_7(%arg0: i32) -> (i32, i32, i32) {
    %c0_i32 = arith.constant 0 : i32
    %c0_i32_0 = arith.constant 0 : i32
    %c0_i32_1 = arith.constant 0 : i32
    return %arg0, %c0_i32, %c0_i32_0 : i32, i32, i32
  }
}

</mosaic_0001>

<bundles_post_ra>
// kernel: patch_embedding_forward.1
= control target key start
LH: loop header
LB: loop body
LE: loop exit
PB: predicated region body
PF: predicated region fallthrough
CT: control target
= control target key end

     0   :  { %s812_s24 = smov 0   ;;  %s931_s0 = inlined_call_operand.vmem [shape: f32[2,64,16], index: 0, kind: input, shape index: {}]   ;;  %s932_s1 = inlined_call_operand.vmem [shape: f32[16,16], index: 1, kind: input, shape index: {}]   ;;  %s933_s2 = inlined_call_operand.vmem [shape: f32[1,16], index: 2, kind: input, shape index: {}]   ;;  %s934_s3 = inlined_call_operand.vmem [shape: f32[1,16], index: 3, kind: input, shape index: {}]   ;;  %s935_s4 = inlined_call_operand.vmem [shape: f32[1,16], index: 4, kind: input, shape index: {}]   ;;  %s936_s5 = inlined_call_operand.vmem [shape: f32[64,16], index: 5, kind: input, shape index: {}]   ;;  %s937_s6 = inlined_call_operand.vmem [shape: f32[2,1,16], index: 6, kind: output, shape index: {0}]   ;;  %s938_s7 = inlined_call_operand.vmem [shape: f32[2,64,16], index: 7, kind: output, shape index: {1}]  }
   0x1 LB: > { %s721_s25 = sadd.s32 4294967295, %s770_s24   ;;  %p725_p0 = scmp.ge.s32.totalorder %s770_s24, 1  ;;  %s770_s24 = sphi %s812_s24, %s18_s24  }
   0x2   : > { %p240_p1 = scmp.lt.s32.totalorder %s770_s24, 3 }
   0x4   : > { %p241_p2 = pnand %p725_p0, %p240_p1 }
   0x5   : > { %p275_p3 = scmp.lt.s32.totalorder (!%p241_p2), %s721_s25, 1 }
   0x6   : > { %244 = sbr.rel (%p241_p2) target bundleno = 468 (0x1d4), region = 44 }
   0xb   : > { %v289_v0 = vld [vmem:[%s932_s1 + $0x8] sm:$0xff]  ;;  %v288_v1 = vld [vmem:[%s932_s1] sm:$0xff]  ;;  %s940_s25 = smov (!%p275_p3, %s721_s25), 1  ;;  %vm294_vm0 = vcmask 122880   ;;  %vm307_vm1 = vcmask 130048   ;;  %v379_v52 = vld [vmem:[%s936_s5 + $0x30] sm:$0xff] }
   0xc   : > { %v291_v2 = vld [vmem:[%s934_s3] sm:$0x1]  ;;  %346 = vmatpush.msra.mxu0 %v289_v0  ;;  %751 = vmatpush.msra.mxu3 %v289_v0  ;;  %s748_s11 = sshll.u32 %s940_s25, 6  ;;  %s282_s14 = scalar_lea.vmem %s937_s6, %s940_s25  ;;  %v374_v44 = vld [vmem:[%s936_s5 + $0x8] sm:$0xff]  ;;  %v375_v56 = vld [vmem:[%s936_s5 + $0x10] sm:$0xff] }
   0xd   : > { %v292_v3 = vld [vmem:[%s935_s4] sm:$0x1]  ;;  %750 = vmatpush.msra.mxu2 %v289_v0  ;;  %441 = vmatpush.msra.mxu1 %v289_v0  ;;  %s279_s17 = scalar_lea.vmem %s931_s0, %s748_s11  ;;  %s886_s28 = scalar_lea.vmem %s938_s7, %s748_s11  ;;  %v378_v47 = vld [vmem:[%s936_s5 + $0x28] sm:$0xff]  ;;  %v380_v59 = vld [vmem:[%s936_s5 + $0x38] sm:$0xff] }
   0xe   : > { %v293_v4 = vadd.f32 %v292_v3, %v291_v2  ;;  %347 = vmatpush.msra.mxu0 %v288_v1  ;;  %753 = vmatpush.msra.mxu3 %v288_v1  ;;  %v296_v5 = vld [vmem:[%s279_s17] sm:$0xff]  ;;  %v302_v6 = vld [vmem:[%s279_s17 + $0x30] sm:$0xff]  ;;  %v297_v8 = vld [vmem:[%s279_s17 + $0x8] sm:$0xff] }
   0xf   : > { %752 = vmatpush.msra.mxu2 %v288_v1  ;;  %442 = vmatpush.msra.mxu1 %v288_v1  ;;  %v300_v7 = vld [vmem:[%s279_s17 + $0x20] sm:$0xff]  ;;  %v303_v9 = vld [vmem:[%s279_s17 + $0x38] sm:$0xff]  ;;  %v301_v10 = vld [vmem:[%s279_s17 + $0x28] sm:$0xff] }
  0x10   : > { %567 = vmatpush.msrb.mxu3 %v289_v0  ;;  %295 = vst.msk [vmem:[%s282_s14] sm:$0x1] %vm294_vm0, %v293_v4  ;;  %730 = vmatmul.msk.f32.vlgmr.msra.gmra.mxu0 %vm307_vm1, %v296_v5  ;;  %v298_v11 = vld [vmem:[%s279_s17 + $0x10] sm:$0xff]  ;;  %v299_v12 = vld [vmem:[%s279_s17 + $0x18] sm:$0xff]  ;;  %v855_v13 = vld [vmem:[%s933_s2] ss:$0 sm:$0xff] }
  0x11   : > { %504 = vmatpush.msrb.mxu2 %v289_v0  ;;  %630 = vmatpush.msrb.mxu1 %v289_v0  ;;  %v373_v38 = vld [vmem:[%s936_s5] sm:$0xff]  ;;  %v382_v48 = vadd.f32 %v855_v13, %v374_v44  ;;  %v386_v49 = vadd.f32 %v855_v13, %v378_v47  ;;  %v387_v55 = vadd.f32 %v855_v13, %v379_v52  ;;  %v376_v0 = vld [vmem:[%s936_s5 + $0x18] sm:$0xff] }
  0x12   : > { %568 = vmatpush.msrb.mxu3 %v288_v1  ;;  %734 = vmatmul.msk.f32.vlgmr.msra.gmra.mxu2 %vm307_vm1, %v300_v7  ;;  %v377_v39 = vld [vmem:[%s936_s5 + $0x20] sm:$0xff]  ;;  %v381_v40 = vadd.f32 %v855_v13, %v373_v38  ;;  %v383_v60 = vadd.f32 %v855_v13, %v375_v56  ;;  %v388_v61 = vadd.f32 %v855_v13, %v380_v59 }
  0x13   : > { %505 = vmatpush.msrb.mxu2 %v288_v1  ;;  %736 = vmatmul.msk.f32.vlgmr.msra.gmra.mxu3 %vm307_vm1, %v302_v6  ;;  %v385_v41 = vadd.f32 %v855_v13, %v377_v39  ;;  %v384_v3 = vadd.f32 %v855_v13, %v376_v0 }
  0x14   : > { %631 = vmatpush.msrb.mxu1 %v288_v1 }
  0x18   : > { %731 = vmatmul.msk.f32.gmra.mxu0 %vm307_vm1, %v297_v8 }
  0x1a   : > { %735 = vmatmul.msk.f32.gmra.mxu2 %vm307_vm1, %v301_v10 }
  0x1b   : > { %737 = vmatmul.msk.f32.gmra.mxu3 %vm307_vm1, %v303_v9 }
  0x20   : > { %732 = vmatmul.msk.f32.gmra.mxu0 %vm307_vm1, %v298_v11 }
  0x28   : > { %733 = vmatmul.msk.f32.gmra.mxu0 %vm307_vm1, %v299_v12 }
  0x8d   : > { %v349_v14 = vpop.f32.mrf.mxu0 }
  0x8e   : > { %v350_v15 = vadd.f32 %v855_v13, %v349_v14 }
  0x90   : > { %389 = vxpose.xlu0.b32.start [1/2] (short) (narrow) %v350_v15, 16 }
  0x95   : > { %v361_v16 = vpop.f32.mrf.mxu2  ;;  %v352_v17 = vpop.f32.mrf.mxu0 }
  0x96   : > { %v362_v18 = vadd.f32 %v855_v13, %v361_v16  ;;  %v353_v19 = vadd.f32 %v855_v13, %v352_v17  ;;  %v367_v20 = vpop.f32.mrf.mxu3 }
  0x97   : > { %v368_v21 = vadd.f32 %v855_v13, %v367_v20 }
  0x98   : > { %515 = vxpose.xlu2.b32.start [1/2] (short) (narrow) %v362_v18, 16  ;;  %390 = vxpose.xlu0.b32.end [2/2] (short) (narrow) %v353_v19, 16 }
  0x9d   : > { %v364_v22 = vpop.f32.mrf.mxu2  ;;  %v355_v23 = vpop.f32.mrf.mxu0 }
  0x9e   : > { %v365_v24 = vadd.f32 %v855_v13, %v364_v22  ;;  %v356_v25 = vadd.f32 %v855_v13, %v355_v23  ;;  %v370_v26 = vpop.f32.mrf.mxu3 }
  0x9f   : > { %v371_v27 = vadd.f32 %v855_v13, %v370_v26 }
  0xa0   : > { %516 = vxpose.xlu2.b32.end [2/2] (short) (narrow) %v365_v24, 16  ;;  %452 = vxpose.xlu1.b32.start [1/2] (short) (narrow) %v356_v25, 16 }
  0xa1   : > { %578 = vxpose.xlu0.b32.start [1/2] (short) (narrow) %v368_v21, 16 }
  0xa5   : > { %v358_v28 = vpop.f32.mrf.mxu0 }
  0xa6   : > { %v359_v29 = vadd.f32 %v855_v13, %v358_v28 }
  0xa8   : > { %453 = vxpose.xlu1.b32.end [2/2] (short) (narrow) %v359_v29, 16 }
  0xa9   : > { %579 = vxpose.xlu0.b32.end [2/2] (short) (narrow) %v371_v27, 16 }
 0x131   : > { %v531_v30 = vpop.trf.xlu2 }
 0x132   : > { %742 = vmatmul.msk.f32.vlgmr.msrb.gmra.mxu3 %vm307_vm1, %v531_v30 }
 0x134   : > { %v405_v31 = vpop.trf.xlu0 }
 0x135   : > { %738 = vmatmul.msk.f32.vlgmr.msra.gmra.mxu1 %vm307_vm1, %v405_v31 }
 0x139   : > { %v532_v32 = vpop.trf.xlu2 }
 0x13a   : > { %743 = vmatmul.msk.f32.gmra.mxu3 %vm307_vm1, %v532_v32 }
 0x13c   : > { %v406_v33 = vpop.trf.xlu0 }
 0x13d   : > { %739 = vmatmul.msk.f32.gmra.mxu1 %vm307_vm1, %v406_v33 }
 0x144   : > { %v468_v34 = vpop.trf.xlu1 }
 0x145   : > { %v594_v35 = vpop.trf.xlu0  ;;  %740 = vmatmul.msk.f32.vlgmr.msrb.gmra.mxu2 %vm307_vm1, %v468_v34 }
 0x146   : > { %744 = vmatmul.msk.f32.vlgmr.msrb.gmra.mxu1 %vm307_vm1, %v594_v35 }
 0x14c   : > { %v469_v36 = vpop.trf.xlu1 }
 0x14d   : > { %v595_v37 = vpop.trf.xlu0  ;;  %741 = vmatmul.msk.f32.gmra.mxu2 %vm307_vm1, %v469_v36 }
 0x14e   : > { %745 = vmatmul.msk.f32.gmra.mxu1 %vm307_vm1, %v595_v37 }
 0x1b2   : > { %v444_v42 = vpop.f32.mrf.mxu1 }
 0x1b3   : > { %v445_v43 = vadd.f32 %v444_v42, %v381_v40 }
 0x1b5   : > { %v570_v45 = vpop.f32.mrf.mxu3  ;;  %450 = vst.msk [vmem:[%s886_s28] sm:$0xff] %vm307_vm1, %v445_v43 }
 0x1b6   : > { %v571_v46 = vadd.f32 %v570_v45, %v385_v41 }
 0x1b8   : > { %576 = vst.msk [vmem:[%s886_s28 + $0x20] sm:$0xff] %vm307_vm1, %v571_v46 }
 0x1ba   : > { %v447_v50 = vpop.f32.mrf.mxu1 }
 0x1bb   : > { %v448_v51 = vadd.f32 %v447_v50, %v382_v48 }
 0x1bd   : > { %v573_v53 = vpop.f32.mrf.mxu3  ;;  %451 = vst.msk [vmem:[%s886_s28 + $0x8] sm:$0xff] %vm307_vm1, %v448_v51 }
 0x1be   : > { %v574_v54 = vadd.f32 %v573_v53, %v386_v49 }
 0x1c0   : > { %577 = vst.msk [vmem:[%s886_s28 + $0x28] sm:$0xff] %vm307_vm1, %v574_v54 }
 0x1c3   : > { %v633_v57 = vpop.f32.mrf.mxu1 }
 0x1c4   : > { %v634_v58 = vadd.f32 %v633_v57, %v387_v55 }
 0x1c6   : > { %639 = vst.msk [vmem:[%s886_s28 + $0x30] sm:$0xff] %vm307_vm1, %v634_v58 }
 0x1c8   : > { %v507_v62 = vpop.f32.mrf.mxu2 }
 0x1c9   : > { %v508_v63 = vadd.f32 %v507_v62, %v383_v60 }
 0x1cb   : > { %v636_v1 = vpop.f32.mrf.mxu1  ;;  %513 = vst.msk [vmem:[%s886_s28 + $0x10] sm:$0xff] %vm307_vm1, %v508_v63 }
 0x1cc   : > { %v637_v2 = vadd.f32 %v636_v1, %v388_v61 }
 0x1ce   : > { %640 = vst.msk [vmem:[%s886_s28 + $0x38] sm:$0xff] %vm307_vm1, %v637_v2 }
 0x1d0   : > { %v510_v4 = vpop.f32.mrf.mxu2 }
 0x1d1   : > { %v511_v5 = vadd.f32 %v510_v4, %v384_v3 }
 0x1d3   : > { %514 = vst.msk [vmem:[%s886_s28 + $0x18] sm:$0xff] %vm307_vm1, %v511_v5 }
 0x1d4 PF: > { %s18_s24 = sadd.s32 1, %s770_s24  }
 0x1d5   : > { %p15_p4 = scmp.ge.s32.totalorder %s18_s24, 4  }
 0x1d7   :  { %17 = sbr.rel (!%p15_p4) target bundleno = 1 (0x1), region = 86 }

</bundles_post_ra>
